<compile_context>
chip_gen: v5e
topology: v5e:2x2
jax: 0.10.0
libtpu: 0.0.40
codegen_flags: <defaults>
</compile_context>

<pallas_src>
import math
from functools import partial

import jax
import jax.numpy as jnp
from jax.experimental import pallas as pl
from jax.experimental.pallas import tpu as pltpu


_NEG_BIG = -9000000000000000.0   # same mask constant as the PyTorch module


def _round_up(x, m):
    return ((x + m - 1) // m) * m


def _pick_divisor_tile(n, candidates=(1024, 512, 256, 128)):
    for c in candidates:
        if c <= n and n % c == 0:
            return c
    return n


# ---------------------------------------------------------------------------
# Kernel 1: fused projection.
#   hw  = h @ W          (f32 MXU)
#   hwb = hw (bf16)      -> the only hw copy the attention kernel reads
#   hw1 = sum(hw * v1)   per row (f32)
#   hw2 = sum(hw * v2)   per row (f32)
# One pass over hw produces everything the attention kernel needs; no f32 hw
# round-trip through HBM.
# ---------------------------------------------------------------------------
def _proj_kernel(h_ref, w_ref, v1_ref, v2_ref, hwb_ref, hw1_ref, hw2_ref):
    hw = jnp.dot(h_ref[...], w_ref[...], preferred_element_type=jnp.float32)
    hwb_ref[...] = hw.astype(hwb_ref.dtype)
    hw1_ref[...] = jnp.sum(hw * v1_ref[...], axis=-1, keepdims=True)
    hw2_ref[...] = jnp.sum(hw * v2_ref[...], axis=-1, keepdims=True)


# ---------------------------------------------------------------------------
# Kernel 2: masked attention with online softmax (flash-attention style).
# grid = (query tiles, key tiles); the key axis is the reduction axis.
# hw1 arrives as a (tq, 1) column tile, hw2 as a lane-dense (1, tk) row tile,
# the key-side hw as bf16 (streamed tiles, or fully VMEM-resident for small N).
# ---------------------------------------------------------------------------
def _gat_attn_kernel(hw1_ref, hw2_ref, hwk_ref, adj_ref, out_ref,
                     m_sc, l_sc, acc_sc, *, tk, keys_resident):
    ki = pl.program_id(1)

    @pl.when(ki == 0)
    def _init():
        m_sc[...] = jnp.full_like(m_sc, -jnp.inf)
        l_sc[...] = jnp.zeros_like(l_sc)
        acc_sc[...] = jnp.zeros_like(acc_sc)

    if keys_resident:
        # hw (keys) lives fully in VMEM; slice the current key tile in-kernel.
        k0 = pl.multiple_of(ki * tk, tk)
        hw_k = hwk_ref[pl.ds(k0, tk), :]                         # (TK, F) bf16
    else:
        hw_k = hwk_ref[...]                                      # (TK, F) bf16

    # e_ij = hw1_i + hw2_j ; mask non-edges on the native int8 adjacency.
    s = hw1_ref[...] + hw2_ref[...]                              # (TQ, TK) f32
    s = jnp.where(adj_ref[...] > 0, s, _NEG_BIG)

    # Online softmax update.
    m_prev = m_sc[...]
    m_new = jnp.maximum(m_prev, jnp.max(s, axis=1, keepdims=True))
    alpha = jnp.exp(m_prev - m_new)
    p = jnp.exp(s - m_new)
    l_sc[...] = alpha * l_sc[...] + jnp.sum(p, axis=1, keepdims=True)
    acc_sc[...] = alpha * acc_sc[...] + jnp.dot(
        p.astype(hw_k.dtype), hw_k, preferred_element_type=jnp.float32)
    m_sc[...] = m_new

    @pl.when(ki == pl.num_programs(1) - 1)
    def _finalize():
        out_ref[...] = (acc_sc[...] *
                        pl.reciprocal(l_sc[...], approx=True)
                        ).astype(out_ref.dtype)


# ---------------------------------------------------------------------------
# Wrapper
# ---------------------------------------------------------------------------
def graph_attention_layer(h, adj, w, v, *, tq=256, tk=512,
                          pv_dtype=jnp.bfloat16,
                          resident_keys_bytes=4 * 1024 * 1024):
    """Pallas GAT layer: h [N, nin], adj [N, N], w [nin, nout], v [2*nout, 1]."""
    h = jnp.asarray(h, jnp.float32)
    w = jnp.asarray(w, jnp.float32)
    v = jnp.asarray(v, jnp.float32)

    N, nin = h.shape
    nout = w.shape[1]

    # Lane-dense feature dim (multiple of 128).
    f_p = _round_up(nout, 128)

    # ---- tile / padding choices --------------------------------------------
    n_128 = _round_up(N, 128)
    tq = min(tq, n_128)
    tk = min(tk, n_128)
    n_p = _round_up(N, math.lcm(tq, tk))
    # Keep >=2 query tiles when possible so the "parallel" query axis can be
    # sharded across v7x's two TensorCores (no effect on v5e/v6e).
    if n_p // tq < 2 and tq > 128:
        tq = max(128, n_p // 2)
        n_p = _round_up(N, math.lcm(tq, tk))
    assert n_p % tq == 0 and n_p % tk == 0

    # ---- padded operands ----------------------------------------------------
    h_p = jnp.zeros((n_p, nin), jnp.float32).at[:N, :].set(h)
    w_p = jnp.zeros((nin, f_p), jnp.float32).at[:, :nout].set(w)
    v1_row = jnp.zeros((1, f_p), jnp.float32).at[0, :nout].set(v[:nout, 0])
    v2_row = jnp.zeros((1, f_p), jnp.float32).at[0, :nout].set(v[nout:, 0])
    # Adjacency travels as int8 (4x less HBM traffic than f32). Zero padding
    # keeps padded keys masked out; padded query rows are sliced off below.
    adj_i8 = jnp.zeros((n_p, n_p), jnp.int8).at[:N, :N].set(
        (jnp.asarray(adj) > 0).astype(jnp.int8))

    # ---- fused projection: hw (bf16), hw1, hw2 ------------------------------
    tp = _pick_divisor_tile(n_p)
    hw_b, hw1, hw2 = pl.pallas_call(
        _proj_kernel,
        out_shape=(jax.ShapeDtypeStruct((n_p, f_p), pv_dtype),
                   jax.ShapeDtypeStruct((n_p, 1), jnp.float32),
                   jax.ShapeDtypeStruct((n_p, 1), jnp.float32)),
        grid_spec=pltpu.PrefetchScalarGridSpec(
            num_scalar_prefetch=0,
            grid=(n_p // tp,),
            in_specs=[pl.BlockSpec((tp, nin), lambda i: (i, 0)),
                      pl.BlockSpec((nin, f_p), lambda i: (0, 0)),
                      pl.BlockSpec((1, f_p), lambda i: (0, 0)),
                      pl.BlockSpec((1, f_p), lambda i: (0, 0))],
            out_specs=[pl.BlockSpec((tp, f_p), lambda i: (i, 0)),
                       pl.BlockSpec((tp, 1), lambda i: (i, 0)),
                       pl.BlockSpec((tp, 1), lambda i: (i, 0))]),
        compiler_params=pltpu.CompilerParams(
            dimension_semantics=("parallel",)),
    )(h_p, w_p, v1_row, v2_row)

    # hw2 is consumed per KEY tile -> present it as a lane-dense (1, n_p) row.
    hw2_row = hw2.T

    # ---- masked attention + aggregation (online softmax) --------------------
    # For moderate N, keep the whole bf16 hw resident in VMEM (eliminates the
    # N/tq-fold re-read from HBM); otherwise stream bf16 key tiles.
    keys_resident = (n_p * f_p * jnp.dtype(pv_dtype).itemsize
                     <= resident_keys_bytes)
    if keys_resident:
        hwk_spec = pl.BlockSpec((n_p, f_p), lambda qi, ki: (0, 0))
    else:
        hwk_spec = pl.BlockSpec((tk, f_p), lambda qi, ki: (ki, 0))

    out_p = pl.pallas_call(
        partial(_gat_attn_kernel, tk=tk, keys_resident=keys_resident),
        out_shape=jax.ShapeDtypeStruct((n_p, f_p), jnp.float32),
        grid_spec=pltpu.PrefetchScalarGridSpec(
            num_scalar_prefetch=0,
            grid=(n_p // tq, n_p // tk),
            in_specs=[
                pl.BlockSpec((tq, 1), lambda qi, ki: (qi, 0)),    # hw1 (queries)
                pl.BlockSpec((1, tk), lambda qi, ki: (0, ki)),    # hw2 (keys)
                hwk_spec,                                         # hw (keys, bf16)
                pl.BlockSpec((tq, tk), lambda qi, ki: (qi, ki)),  # adj tile (int8)
            ],
            out_specs=pl.BlockSpec((tq, f_p), lambda qi, ki: (qi, 0)),
            scratch_shapes=[
                pltpu.VMEM((tq, 1), jnp.float32),     # running max m
                pltpu.VMEM((tq, 1), jnp.float32),     # running denom l
                pltpu.VMEM((tq, f_p), jnp.float32),   # running numerator acc
            ]),
        compiler_params=pltpu.CompilerParams(
            dimension_semantics=("parallel", "arbitrary")),
    )(hw1, hw2_row, hw_b, adj_i8)

    return out_p[:N, :nout]


# ---------------------------------------------------------------------------
# Pure-JAX reference (faithful to the PyTorch forward, full f32 precision)
# ---------------------------------------------------------------------------
def _reference(h, adj, w, v):
    nout = w.shape[1]
    hp = jax.lax.Precision.HIGHEST
    hw = jnp.dot(h, w, precision=hp)
    hw1 = jnp.dot(hw, v[:nout], precision=hp)
    hw2 = jnp.dot(hw, v[nout:], precision=hp)
    eij = hw1 + hw2.T
    att = jnp.where(adj > 0, eij, _NEG_BIG)
    att = jax.nn.softmax(att, axis=1)
    return jnp.dot(att, hw, precision=hp)


if __name__ == "__main__":
    # Small, non-tile-aligned shapes to exercise the padding path.
    N, nin, nout = 200, 16, 48

    key = jax.random.PRNGKey(0)
    k_h, k_w, k_v, k_adj = jax.random.split(key, 4)

    # Deterministic parameter init (module __init__ shapes).
    w = jax.random.normal(k_w, (nin, nout), dtype=jnp.float32)
    v = 0.25 * jax.random.normal(k_v, (2 * nout, 1), dtype=jnp.float32)

    # Inputs: node features and a sparse 0/1 adjacency with self-loops.
    h = jax.random.normal(k_h, (N, nin), dtype=jnp.float32)
    adj = (jax.random.uniform(k_adj, (N, N)) > 0.85).astype(jnp.float32)
    adj = jnp.maximum(adj, jnp.eye(N, dtype=jnp.float32))

    out = graph_attention_layer(h, adj, w, v)
    out = jax.block_until_ready(out)

    ref = _reference(h, adj, w, v)
    assert out.shape == (N, nout)
    # bf16 P·V matmul + approx reciprocal => looser-than-f32 tolerance.
    assert jnp.allclose(out, ref, atol=5e-2, rtol=5e-2), "mismatch vs reference"

    print("KERNEL_OK")
</pallas_src>

<mosaic_0001>
module attributes {stable_mosaic.version = 11 : i64} {
  func.func @_proj_kernel(%arg0: i32, %arg1: memref<256x16xf32, #tpu.memory_space<vmem>>, %arg2: memref<16x128xf32, #tpu.memory_space<vmem>>, %arg3: memref<1x128xf32, #tpu.memory_space<vmem>>, %arg4: memref<1x128xf32, #tpu.memory_space<vmem>>, %arg5: memref<256x128xbf16, #tpu.memory_space<vmem>>, %arg6: memref<256x1xf32, #tpu.memory_space<vmem>>, %arg7: memref<256x1xf32, #tpu.memory_space<vmem>>) attributes {dimension_semantics = [#tpu.dimension_semantics<parallel>], iteration_bounds = array<i64: 1>, scalar_prefetch = 0 : i64, scratch_operands = 0 : i64, tpu.core_type = #tpu.core_type<tc>, window_params = [{transform_indices = @transform_0, window_bounds = array<i64: 256, 16>}, {pipeline_mode = #tpu.pipeline_mode<synchronous>, transform_indices = @transform_1, window_bounds = array<i64: 16, 128>}, {pipeline_mode = #tpu.pipeline_mode<synchronous>, transform_indices = @transform_2, window_bounds = array<i64: 1, 128>}, {pipeline_mode = #tpu.pipeline_mode<synchronous>, transform_indices = @transform_3, window_bounds = array<i64: 1, 128>}, {transform_indices = @transform_4, window_bounds = array<i64: 256, 128>}, {transform_indices = @transform_5, window_bounds = array<i64: 256, 1>}, {transform_indices = @transform_6, window_bounds = array<i64: 256, 1>}]} {
    %c0 = arith.constant 0 : index
    %c0_0 = arith.constant 0 : index
    %0 = vector.load %arg1[%c0, %c0_0] : memref<256x16xf32, #tpu.memory_space<vmem>>, vector<256x16xf32>
    %c0_1 = arith.constant 0 : index
    %c0_2 = arith.constant 0 : index
    %1 = vector.load %arg2[%c0_1, %c0_2] : memref<16x128xf32, #tpu.memory_space<vmem>>, vector<16x128xf32>
    %cst = arith.constant dense<0.000000e+00> : vector<256x128xf32>
    %2 = tpu.matmul %0, %1, %cst {dimension_numbers = #tpu.dot_dimension_numbers<[1], [0], [0], [1], [0, 0, 1, 1], [], []>} : vector<256x16xf32>, vector<16x128xf32>, vector<256x128xf32> -> vector<256x128xf32>
    %3 = arith.truncf %2 : vector<256x128xf32> to vector<256x128xbf16>
    %c0_3 = arith.constant 0 : index
    %c0_4 = arith.constant 0 : index
    %4 = vector.load %arg5[%c0_3, %c0_4] : memref<256x128xbf16, #tpu.memory_space<vmem>>, vector<256x128xbf16>
    tpu.vector_store %arg5[%c0_3, %c0_4], %3 {strides = array<i32>} : memref<256x128xbf16, #tpu.memory_space<vmem>>, vector<256x128xbf16>,
    %c0_5 = arith.constant 0 : index
    %c0_6 = arith.constant 0 : index
    %5 = vector.load %arg3[%c0_5, %c0_6] : memref<1x128xf32, #tpu.memory_space<vmem>>, vector<1x128xf32>
    %6 = vector.broadcast %5 : vector<1x128xf32> to vector<256x128xf32>
    %7 = arith.mulf %2, %6 : vector<256x128xf32>
    %cst_7 = arith.constant dense<0.000000e+00> : vector<256xf32>
    %8 = vector.multi_reduction <add>, %7, %cst_7 [1] : vector<256x128xf32> to vector<256xf32>
    %9 = vector.shape_cast %8 : vector<256xf32> to vector<256x1xf32>
    %c0_8 = arith.constant 0 : index
    %c0_9 = arith.constant 0 : index
    %10 = vector.load %arg6[%c0_8, %c0_9] : memref<256x1xf32, #tpu.memory_space<vmem>>, vector<256x1xf32>
    tpu.vector_store %arg6[%c0_8, %c0_9], %9 {strides = array<i32>} : memref<256x1xf32, #tpu.memory_space<vmem>>, vector<256x1xf32>,
    %c0_10 = arith.constant 0 : index
    %c0_11 = arith.constant 0 : index
    %11 = vector.load %arg4[%c0_10, %c0_11] : memref<1x128xf32, #tpu.memory_space<vmem>>, vector<1x128xf32>
    %12 = vector.broadcast %11 : vector<1x128xf32> to vector<256x128xf32>
    %13 = arith.mulf %2, %12 : vector<256x128xf32>
    %cst_12 = arith.constant dense<0.000000e+00> : vector<256xf32>
    %14 = vector.multi_reduction <add>, %13, %cst_12 [1] : vector<256x128xf32> to vector<256xf32>
    %15 = vector.shape_cast %14 : vector<256xf32> to vector<256x1xf32>
    %c0_13 = arith.constant 0 : index
    %c0_14 = arith.constant 0 : index
    %16 = vector.load %arg7[%c0_13, %c0_14] : memref<256x1xf32, #tpu.memory_space<vmem>>, vector<256x1xf32>
    tpu.vector_store %arg7[%c0_13, %c0_14], %15 {strides = array<i32>} : memref<256x1xf32, #tpu.memory_space<vmem>>, vector<256x1xf32>,
    return
  }
  func.func @transform_0(%arg0: i32) -> (i32, i32) {
    %c0_i32 = arith.constant 0 : i32
    %c0_i32_0 = arith.constant 0 : i32
    return %arg0, %c0_i32 : i32, i32
  }
  func.func @transform_1(%arg0: i32) -> (i32, i32) {
    %c0_i32 = arith.constant 0 : i32
    %c0_i32_0 = arith.constant 0 : i32
    %c0_i32_1 = arith.constant 0 : i32
    return %c0_i32, %c0_i32_0 : i32, i32
  }
  func.func @transform_2(%arg0: i32) -> (i32, i32) {
    %c0_i32 = arith.constant 0 : i32
    %c0_i32_0 = arith.constant 0 : i32
    %c0_i32_1 = arith.constant 0 : i32
    return %c0_i32, %c0_i32_0 : i32, i32
  }
  func.func @transform_3(%arg0: i32) -> (i32, i32) {
    %c0_i32 = arith.constant 0 : i32
    %c0_i32_0 = arith.constant 0 : i32
    %c0_i32_1 = arith.constant 0 : i32
    return %c0_i32, %c0_i32_0 : i32, i32
  }
  func.func @transform_4(%arg0: i32) -> (i32, i32) {
    %c0_i32 = arith.constant 0 : i32
    %c0_i32_0 = arith.constant 0 : i32
    return %arg0, %c0_i32 : i32, i32
  }
  func.func @transform_5(%arg0: i32) -> (i32, i32) {
    %c0_i32 = arith.constant 0 : i32
    %c0_i32_0 = arith.constant 0 : i32
    return %arg0, %c0_i32 : i32, i32
  }
  func.func @transform_6(%arg0: i32) -> (i32, i32) {
    %c0_i32 = arith.constant 0 : i32
    %c0_i32_0 = arith.constant 0 : i32
    return %arg0, %c0_i32 : i32, i32
  }
}

</mosaic_0001>

<bundles_post_ra>
// kernel: tpu_custom_call.1
= control target key start
LH: loop header
LB: loop body
LE: loop exit
PB: predicated region body
PF: predicated region fallthrough
CT: control target
= control target key end

     0   :  { %vm55_vm0 = vcmask 130048   ;;  %s1344_s0 = inlined_call_operand.vmem [shape: f32[256,16], index: 0, kind: input, shape index: {}]   ;;  %s1345_s1 = inlined_call_operand.vmem [shape: f32[16,128], index: 1, kind: input, shape index: {}]   ;;  %s1346_s2 = inlined_call_operand.vmem [shape: f32[1,128], index: 2, kind: input, shape index: {}]   ;;  %s1347_s3 = inlined_call_operand.vmem [shape: f32[1,128], index: 3, kind: input, shape index: {}]   ;;  %s1348_s4 = inlined_call_operand.hbm [shape: bf16[256,128], index: 4, kind: output, shape index: {0}]   ;;  %s1349_s5 = inlined_call_operand.vmem [shape: f32[256,1], index: 5, kind: output, shape index: {1}]   ;;  %s1350_s6 = inlined_call_operand.vmem [shape: f32[256,1], index: 6, kind: output, shape index: {2}]  }
   0x1   :  { %v54_v0 = vld [vmem:[%s1345_s1 + $0x8] sm:$0xff]  ;;  %v53_v1 = vld [vmem:[%s1345_s1] sm:$0xff] }
   0x2   :  { %166 = vmatpush.msra.mxu0 %v54_v0  ;;  %747 = vmatpush.msra.mxu1 %v54_v0  ;;  %v21_v2 = vld [vmem:[%s1344_s0] sm:$0xff] }
   0x3   :  { %749 = vmatpush.msra.mxu3 %v54_v0  ;;  %748 = vmatpush.msra.mxu2 %v54_v0  ;;  %v29_v3 = vld [vmem:[%s1344_s0 + $0x40] sm:$0xff] }
   0x4   :  { %v45_v4 = vld [vmem:[%s1344_s0 + $0xc0] sm:$0xff]  ;;  %167 = vmatpush.msra.mxu0 %v53_v1  ;;  %750 = vmatpush.msra.mxu1 %v53_v1 }
   0x5   :  { %752 = vmatpush.msra.mxu3 %v53_v1  ;;  %620 = vmatmul.msk.f32.vlgmr.msra.gmra.mxu0 %vm55_vm0, %v21_v2  ;;  %v37_v5 = vld [vmem:[%s1344_s0 + $0x80] sm:$0xff] }
   0x6   :  { %628 = vmatmul.msk.f32.vlgmr.msra.gmra.mxu1 %vm55_vm0, %v29_v3  ;;  %644 = vmatmul.msk.f32.vlgmr.msra.gmra.mxu3 %vm55_vm0, %v45_v4 }
   0x7   :  { %751 = vmatpush.msra.mxu2 %v53_v1 }
   0x8   :  { %636 = vmatmul.msk.f32.vlgmr.msra.gmra.mxu2 %vm55_vm0, %v37_v5 }
   0x9   :  { %12 = vsyncpa [#allocation3], 0  ;;  %v22_v6 = vld [vmem:[%s1344_s0 + $0x8] sm:$0xff]  ;;  %v23_v10 = vld [vmem:[%s1344_s0 + $0x10] sm:$0xff]  ;;  %vm429_vm1 = vcmask 7168   ;;  %s784_s19 = smov [#allocation2]  }
   0xa   :  { %v30_v7 = vld [vmem:[%s1344_s0 + $0x48] sm:$0xff]  ;;  %v47_v11 = vld [vmem:[%s1344_s0 + $0xd0] sm:$0xff]  ;;  %v24_v14 = vld [vmem:[%s1344_s0 + $0x18] sm:$0xff]  ;;  %s598_s20 = sshll.u32 %s784_s19, 4  ;;  %s600_s23 = sshll.u32 %s1348_s4, 4  ;;  %s599_s20 = int_to_ptr.vmem [resolvable:$true] %s598_s20  ;;  %s601_s23 = int_to_ptr.hbm [resolvable:$true] %s600_s23 }
   0xb   :  { %v46_v8 = vld [vmem:[%s1344_s0 + $0xc8] sm:$0xff]  ;;  %v31_v12 = vld [vmem:[%s1344_s0 + $0x50] sm:$0xff]  ;;  %v48_v15 = vld [vmem:[%s1344_s0 + $0xd8] sm:$0xff]  ;;  %s785_s4 = smov 64   ;;  %s786_s28 = smov 4  }
   0xc   :  { %v38_v9 = vld [vmem:[%s1344_s0 + $0x88] sm:$0xff]  ;;  %v39_v13 = vld [vmem:[%s1344_s0 + $0x90] sm:$0xff]  ;;  %v32_v16 = vld [vmem:[%s1344_s0 + $0x58] sm:$0xff] }
   0xd   :  { %621 = vmatmul.msk.f32.gmra.mxu0 %vm55_vm0, %v22_v6  ;;  %v40_v17 = vld [vmem:[%s1344_s0 + $0x98] sm:$0xff]  ;;  %v25_v18 = vld [vmem:[%s1344_s0 + $0x20] sm:$0xff]  ;;  %v26_v22 = vld [vmem:[%s1344_s0 + $0x28] sm:$0xff] }
   0xe   :  { %629 = vmatmul.msk.f32.gmra.mxu1 %vm55_vm0, %v30_v7  ;;  %645 = vmatmul.msk.f32.gmra.mxu3 %vm55_vm0, %v46_v8  ;;  %v33_v19 = vld [vmem:[%s1344_s0 + $0x60] sm:$0xff]  ;;  %v34_v23 = vld [vmem:[%s1344_s0 + $0x68] sm:$0xff]  ;;  %v27_v26 = vld [vmem:[%s1344_s0 + $0x30] sm:$0xff] }
   0xf   :  { %v49_v20 = vld [vmem:[%s1344_s0 + $0xe0] sm:$0xff]  ;;  %v50_v24 = vld [vmem:[%s1344_s0 + $0xe8] sm:$0xff]  ;;  %v35_v27 = vld [vmem:[%s1344_s0 + $0x70] sm:$0xff] }
  0x10   :  { %637 = vmatmul.msk.f32.gmra.mxu2 %vm55_vm0, %v38_v9  ;;  %v41_v21 = vld [vmem:[%s1344_s0 + $0xa0] sm:$0xff]  ;;  %v42_v25 = vld [vmem:[%s1344_s0 + $0xa8] sm:$0xff]  ;;  %v51_v28 = vld [vmem:[%s1344_s0 + $0xf0] sm:$0xff] }
  0x11   :  { %v43_v29 = vld [vmem:[%s1344_s0 + $0xb0] sm:$0xff]  ;;  %v36_v30 = vld [vmem:[%s1344_s0 + $0x78] sm:$0xff]  ;;  %v959_v34 = vld [vmem:[%s1346_s2] ss:$0 sm:$0xff] }
  0x12   :  { %v28_v31 = vld [vmem:[%s1344_s0 + $0x38] sm:$0xff]  ;;  %v964_v35 = vld [vmem:[%s1347_s3] ss:$0 sm:$0xff] }
  0x13   :  { %v44_v32 = vld [vmem:[%s1344_s0 + $0xb8] sm:$0xff] }
  0x14   :  { %v52_v33 = vld [vmem:[%s1344_s0 + $0xf8] sm:$0xff] }
  0x15   :  { %622 = vmatmul.msk.f32.gmra.mxu0 %vm55_vm0, %v23_v10 }
  0x16   :  { %646 = vmatmul.msk.f32.gmra.mxu3 %vm55_vm0, %v47_v11  ;;  %630 = vmatmul.msk.f32.gmra.mxu1 %vm55_vm0, %v31_v12 }
  0x18   :  { %638 = vmatmul.msk.f32.gmra.mxu2 %vm55_vm0, %v39_v13 }
  0x1d   :  { %623 = vmatmul.msk.f32.gmra.mxu0 %vm55_vm0, %v24_v14 }
  0x1e   :  { %647 = vmatmul.msk.f32.gmra.mxu3 %vm55_vm0, %v48_v15  ;;  %631 = vmatmul.msk.f32.gmra.mxu1 %vm55_vm0, %v32_v16 }
  0x20   :  { %639 = vmatmul.msk.f32.gmra.mxu2 %vm55_vm0, %v40_v17 }
  0x25   :  { %624 = vmatmul.msk.f32.gmra.mxu0 %vm55_vm0, %v25_v18 }
  0x26   :  { %632 = vmatmul.msk.f32.gmra.mxu1 %vm55_vm0, %v33_v19  ;;  %648 = vmatmul.msk.f32.gmra.mxu3 %vm55_vm0, %v49_v20 }
  0x28   :  { %640 = vmatmul.msk.f32.gmra.mxu2 %vm55_vm0, %v41_v21 }
  0x2d   :  { %625 = vmatmul.msk.f32.gmra.mxu0 %vm55_vm0, %v26_v22 }
  0x2e   :  { %633 = vmatmul.msk.f32.gmra.mxu1 %vm55_vm0, %v34_v23  ;;  %649 = vmatmul.msk.f32.gmra.mxu3 %vm55_vm0, %v50_v24 }
  0x30   :  { %641 = vmatmul.msk.f32.gmra.mxu2 %vm55_vm0, %v42_v25 }
  0x35   :  { %626 = vmatmul.msk.f32.gmra.mxu0 %vm55_vm0, %v27_v26 }
  0x36   :  { %634 = vmatmul.msk.f32.gmra.mxu1 %vm55_vm0, %v35_v27  ;;  %650 = vmatmul.msk.f32.gmra.mxu3 %vm55_vm0, %v51_v28 }
  0x38   :  { %642 = vmatmul.msk.f32.gmra.mxu2 %vm55_vm0, %v43_v29 }
  0x3d   :  { %627 = vmatmul.msk.f32.gmra.mxu0 %vm55_vm0, %v28_v31 }
  0x3e   :  { %635 = vmatmul.msk.f32.gmra.mxu1 %vm55_vm0, %v36_v30  ;;  %651 = vmatmul.msk.f32.gmra.mxu3 %vm55_vm0, %v52_v33 }
  0x40   :  { %643 = vmatmul.msk.f32.gmra.mxu2 %vm55_vm0, %v44_v32 }
  0x82   :  { %v169_v36 = vpop.f32.mrf.mxu0 }
  0x83   :  { %v193_v37 = vpop.f32.mrf.mxu1  ;;  %v333_v38 = vmul.f32 %v959_v34, %v169_v36  ;;  %v466_v49 = vmul.f32 %v964_v35, %v169_v36 }
  0x84   :  { %v474_v39 = vmul.f32 %v964_v35, %v193_v37  ;;  %v341_v40 = vmul.f32 %v959_v34, %v193_v37 }
  0x85   :  { %365 = vadd.xlane.f32.xlu0 %v333_v38 }
  0x86   :  { %514 = vadd.xlane.f32.xlu1 %v474_v39  ;;  %381 = vadd.xlane.f32.xlu2 %v341_v40 }
  0x89   :  { %v241_v41 = vpop.f32.mrf.mxu3 }
  0x8a   :  { %v172_v42 = vpop.f32.mrf.mxu0  ;;  %v357_v43 = vmul.f32 %v959_v34, %v241_v41  ;;  %v490_v58 = vmul.f32 %v964_v35, %v241_v41 }
  0x8b   :  { %v655_v44 = vpack.c.bf16 %v172_v42, %v169_v36  ;;  %v196_v45 = vpop.f32.mrf.mxu1  ;;  %v217_v46 = vpop.f32.mrf.mxu2  ;;  %v334_v59 = vmul.f32 %v959_v34, %v172_v42  ;;  %v467_v13 = vmul.f32 %v964_v35, %v172_v42 }
  0x8c   :  { %v675_v47 = vpack.c.bf16 %v196_v45, %v193_v37  ;;  %v349_v48 = vmul.f32 %v959_v34, %v217_v46  ;;  %v482_v51 = vmul.f32 %v964_v35, %v217_v46  ;;  %v475_v62 = vmul.f32 %v964_v35, %v196_v45 }
  0x8d   :  { %656 = vst [vmem:[#allocation2] sm:$0xff] %v655_v44   ;;  %413 = vadd.xlane.f32.xlu0 %v357_v43  ;;  %v342_v4 = vmul.f32 %v959_v34, %v196_v45 }
  0x8e   :  { %735 = vst [vmem:[#allocation2 + $0x20] sm:$0xff] %v675_v47   ;;  %397 = vadd.xlane.f32.xlu1 %v349_v48  ;;  %498 = vadd.xlane.f32.xlu2 %v466_v49 }
  0x91   :  { %v244_v50 = vpop.f32.mrf.mxu3 }
  0x92   :  { %v715_v52 = vpack.c.bf16 %v244_v50, %v241_v41  ;;  %v358_v53 = vmul.f32 %v959_v34, %v244_v50  ;;  %v175_v54 = vpop.f32.mrf.mxu0  ;;  %v491_v17 = vmul.f32 %v964_v35, %v244_v50 }
  0x93   :  { %v220_v55 = vpop.f32.mrf.mxu2  ;;  %v199_v56 = vpop.f32.mrf.mxu1  ;;  %v335_v7 = vmul.f32 %v959_v34, %v175_v54  ;;  %v468_v18 = vmul.f32 %v964_v35, %v175_v54 }
  0x94   :  { %743 = vst [vmem:[#allocation2 + $0x60] sm:$0xff] %v715_v52   ;;  %v695_v57 = vpack.c.bf16 %v220_v55, %v217_v46  ;;  %v483_v61 = vmul.f32 %v964_v35, %v220_v55  ;;  %v350_v6 = vmul.f32 %v959_v34, %v220_v55  ;;  %v343_v12 = vmul.f32 %v959_v34, %v199_v56 }
  0x95   :  { %530 = vadd.xlane.f32.xlu0 %v482_v51  ;;  %v476_v25 = vmul.f32 %v964_v35, %v199_v56 }
  0x96   :  { %739 = vst [vmem:[#allocation2 + $0x40] sm:$0xff] %v695_v57   ;;  %415 = vadd.xlane.f32.xlu1 %v358_v53  ;;  %546 = vadd.xlane.f32.xlu2 %v490_v58 }
  0x99   :  { %v247_v60 = vpop.f32.mrf.mxu3 }
  0x9a   :  { %v178_v63 = vpop.f32.mrf.mxu0  ;;  %v359_v11 = vmul.f32 %v959_v34, %v247_v60  ;;  %v492_v26 = vmul.f32 %v964_v35, %v247_v60 }
  0x9b   :  { %v660_v0 = vpack.c.bf16 %v178_v63, %v175_v54  ;;  %v202_v1 = vpop.f32.mrf.mxu1  ;;  %v223_v2 = vpop.f32.mrf.mxu2  ;;  %v469_v30 = vmul.f32 %v964_v35, %v178_v63  ;;  %v336_v31 = vmul.f32 %v959_v34, %v178_v63 }
  0x9c   :  { %v680_v3 = vpack.c.bf16 %v202_v1, %v199_v56  ;;  %v484_v16 = vmul.f32 %v964_v35, %v223_v2  ;;  %v344_v24 = vmul.f32 %v959_v34, %v202_v1  ;;  %v351_v32 = vmul.f32 %v959_v34, %v223_v2 }
  0x9d   :  { %367 = vadd.xlane.f32.xlu0 %v334_v59  ;;  %732 = vst [vmem:[#allocation2 + $0x8] sm:$0xff] %v660_v0   ;;  %v477_v39 = vmul.f32 %v964_v35, %v202_v1 }
  0x9e   :  { %532 = vadd.xlane.f32.xlu1 %v483_v61  ;;  %516 = vadd.xlane.f32.xlu2 %v475_v62  ;;  %736 = vst [vmem:[#allocation2 + $0x28] sm:$0xff] %v680_v3  }
  0xa1   :  { %v250_v5 = vpop.f32.mrf.mxu3 }
  0xa2   :  { %v720_v8 = vpack.c.bf16 %v250_v5, %v247_v60  ;;  %v181_v14 = vpop.f32.mrf.mxu0  ;;  %v360_v37 = vmul.f32 %v959_v34, %v250_v5  ;;  %v493_v38 = vmul.f32 %v964_v35, %v250_v5 }
  0xa3   :  { %v226_v9 = vpop.f32.mrf.mxu2  ;;  %v205_v15 = vpop.f32.mrf.mxu1  ;;  %v337_v42 = vmul.f32 %v959_v34, %v181_v14  ;;  %v470_v50 = vmul.f32 %v964_v35, %v181_v14 }
  0xa4   :  { %744 = vst [vmem:[#allocation2 + $0x68] sm:$0xff] %v720_v8   ;;  %v700_v10 = vpack.c.bf16 %v226_v9, %v223_v2  ;;  %v485_v40 = vmul.f32 %v964_v35, %v226_v9  ;;  %v352_v41 = vmul.f32 %v959_v34, %v226_v9  ;;  %v345_v43 = vmul.f32 %v959_v34, %v205_v15 }
  0xa5   :  { %383 = vadd.xlane.f32.xlu0 %v342_v4  ;;  %v478_v45 = vmul.f32 %v964_v35, %v205_v15 }
  0xa6   :  { %399 = vadd.xlane.f32.xlu2 %v350_v6  ;;  %369 = vadd.xlane.f32.xlu1 %v335_v7  ;;  %740 = vst [vmem:[#allocation2 + $0x48] sm:$0xff] %v700_v10  }
  0xa9   :  { %v253_v23 = vpop.f32.mrf.mxu3 }
  0xaa   :  { %v987_v19 = vpop.f32.mrf.mxu0  ;;  %v361_v44 = vmul.f32 %v959_v34, %v253_v23  ;;  %v494_v59 = vmul.f32 %v964_v35, %v253_v23 }
  0xab   :  { %v989_v20 = vpop.f32.mrf.mxu1  ;;  %v665_v21 = vpack.c.bf16 %v987_v19, %v181_v14  ;;  %v229_v27 = vpop.f32.mrf.mxu2  ;;  %v338_v58 = vmul.f32 %v959_v34, %v987_v19  ;;  %v471_v1 = vmul.f32 %v964_v35, %v987_v19 }
  0xac   :  { %v685_v22 = vpack.c.bf16 %v989_v20, %v205_v15  ;;  %v486_v48 = vmul.f32 %v964_v35, %v229_v27  ;;  %v353_v49 = vmul.f32 %v959_v34, %v229_v27  ;;  %v346_v57 = vmul.f32 %v959_v34, %v989_v20 }
  0xad   :  { %500 = vadd.xlane.f32.xlu0 %v467_v13  ;;  %733 = vst [vmem:[#allocation2 + $0x10] sm:$0xff] %v665_v21   ;;  %v479_v0 = vmul.f32 %v964_v35, %v989_v20 }
  0xae   :  { %417 = vadd.xlane.f32.xlu2 %v359_v11  ;;  %385 = vadd.xlane.f32.xlu1 %v343_v12  ;;  %737 = vst [vmem:[#allocation2 + $0x30] sm:$0xff] %v685_v22  }
  0xb1   :  { %v996_v28 = vpop.f32.mrf.mxu3 }
  0xb2   :  { %v725_v29 = vpack.c.bf16 %v996_v28, %v253_v23  ;;  %v1014_v46 = vpop.f32.mrf.mxu0  ;;  %v362_v2 = vmul.f32 %v959_v34, %v996_v28 }
  0xb3   :  { %v1002_v33 = vpop.f32.mrf.mxu2  ;;  %v211_v47 = vpop.f32.mrf.mxu1  ;;  %v339_v12 = vmul.f32 %v959_v34, %v1014_v46  ;;  %v472_v20 = vmul.f32 %v964_v35, %v1014_v46 }
  0xb4   :  { %745 = vst [vmem:[#allocation2 + $0x70] sm:$0xff] %v725_v29   ;;  %v705_v36 = vpack.c.bf16 %v1002_v33, %v229_v27  ;;  %v354_v6 = vmul.f32 %v959_v34, %v1002_v33  ;;  %v480_v7 = vmul.f32 %v964_v35, %v211_v47  ;;  %v487_v8 = vmul.f32 %v964_v35, %v1002_v33 }
  0xb5   :  { %548 = vadd.xlane.f32.xlu0 %v491_v17  ;;  %v347_v14 = vmul.f32 %v959_v34, %v211_v47 }
  0xb6   :  { %534 = vadd.xlane.f32.xlu2 %v484_v16  ;;  %502 = vadd.xlane.f32.xlu1 %v468_v18  ;;  %741 = vst [vmem:[#allocation2 + $0x50] sm:$0xff] %v705_v36  }
  0xb9   :  { %v1028_v56 = vpop.f32.mrf.mxu3 }
  0xba   :  { %v1019_v51 = vpop.f32.mrf.mxu0  ;;  %v363_v18 = vmul.f32 %v959_v34, %v1028_v56 }
  0xbb   :  { %v1021_v52 = vpop.f32.mrf.mxu1  ;;  %v670_v53 = vpack.c.bf16 %v1019_v51, %v1014_v46  ;;  %v1026_v55 = vpop.f32.mrf.mxu2  ;;  %v340_v19 = vmul.f32 %v959_v34, %v1019_v51 }
  0xbc   :  { %v690_v54 = vpack.c.bf16 %v1021_v52, %v211_v47  ;;  %v355_v13 = vmul.f32 %v959_v34, %v1026_v55 }
  0xbd   :  { %518 = vadd.xlane.f32.xlu0 %v476_v25  ;;  %734 = vst [vmem:[#allocation2 + $0x18] sm:$0xff] %v670_v53  }
  0xbe   :  { %387 = vadd.xlane.f32.xlu2 %v344_v24  ;;  %550 = vadd.xlane.f32.xlu1 %v492_v26  ;;  %738 = vst [vmem:[#allocation2 + $0x38] sm:$0xff] %v690_v54   ;;  %v481_v24 = vmul.f32 %v964_v35, %v1021_v52  ;;  %v488_v26 = vmul.f32 %v964_v35, %v1026_v55 }
  0xc1   :  { %v1037_v61 = vpop.f32.mrf.mxu3 }
  0xc2   :  { %v730_v63 = vpack.c.bf16 %v1037_v61, %v1028_v56  ;;  %v364_v25 = vmul.f32 %v959_v34, %v1037_v61 }
  0xc3   :  { %v1035_v60 = vpop.f32.mrf.mxu2 }
  0xc4   :  { %v710_v62 = vpack.c.bf16 %v1035_v60, %v1026_v55  ;;  %746 = vst [vmem:[#allocation2 + $0x78] sm:$0xff] %v730_v63   ;;  %v489_v33 = vmul.f32 %v964_v35, %v1035_v60 }
  0xc5   :  { %401 = vadd.xlane.f32.xlu0 %v351_v32  ;;  %v356_v32 = vmul.f32 %v959_v34, %v1035_v60 }
  0xc6   :  { %504 = vadd.xlane.f32.xlu2 %v469_v30  ;;  %371 = vadd.xlane.f32.xlu1 %v336_v31  ;;  %742 = vst [vmem:[#allocation2 + $0x58] sm:$0xff] %v710_v62   ;;  %v348_v31 = vmul.f32 %v959_v34, %v1021_v52  ;;  %v473_v34 = vmul.f32 %v964_v35, %v1019_v51 }
  0xc7   :  { %606 = dma.vmem_to_hbm [thread:$0]  %s599_s20, 2048, %s601_s23, [#allocation3], %s785_s4, %s785_s4, %s786_s28  }
  0xcd   :  { %419 = vadd.xlane.f32.xlu0 %v360_v37 }
  0xce   :  { %552 = vadd.xlane.f32.xlu2 %v493_v38  ;;  %520 = vadd.xlane.f32.xlu1 %v477_v39  ;;  %v496_v39 = vmul.f32 %v964_v35, %v1028_v56 }
  0xd5   :  { %536 = vadd.xlane.f32.xlu0 %v485_v40  ;;  %v495_v40 = vmul.f32 %v964_v35, %v996_v28  ;;  %v497_v28 = vmul.f32 %v964_v35, %v1037_v61 }
  0xd6   :  { %403 = vadd.xlane.f32.xlu1 %v352_v41  ;;  %373 = vadd.xlane.f32.xlu2 %v337_v42 }
  0xdd   :  { %389 = vadd.xlane.f32.xlu0 %v345_v43 }
  0xde   :  { %421 = vadd.xlane.f32.xlu1 %v361_v44  ;;  %522 = vadd.xlane.f32.xlu2 %v478_v45 }
  0xe5   :  { %506 = vadd.xlane.f32.xlu0 %v470_v50 }
  0xe6   :  { %538 = vadd.xlane.f32.xlu1 %v486_v48  ;;  %405 = vadd.xlane.f32.xlu2 %v353_v49 }
  0xed   :  { %554 = vadd.xlane.f32.xlu0 %v494_v59 }
  0xee   :  { %391 = vadd.xlane.f32.xlu1 %v346_v57  ;;  %375 = vadd.xlane.f32.xlu2 %v338_v58 }
  0xf5   :  { %524 = vadd.xlane.f32.xlu0 %v479_v0 }
  0xf6   :  { %508 = vadd.xlane.f32.xlu1 %v471_v1  ;;  %423 = vadd.xlane.f32.xlu2 %v362_v2 }
  0xf8   :  { %v366_v3 = vpop.xlane.xlu0 %365 }
  0xf9   :  { %v515_v4 = vpop.xlane.xlu1 %514  ;;  %v382_v5 = vpop.xlane.xlu2 %381  ;;  %430 = vst.msk [vmem:[%s1349_s5] sm:$0xff] %vm429_vm1, %v366_v3 }
  0xfa   :  { %570 = vst.msk [vmem:[%s1350_s6 + $0x40] sm:$0xff] %vm429_vm1, %v515_v4 }
  0xfb   :  { %438 = vst.msk [vmem:[%s1349_s5 + $0x40] sm:$0xff] %vm429_vm1, %v382_v5 }
  0xfd   :  { %407 = vadd.xlane.f32.xlu0 %v354_v6 }
  0xfe   :  { %526 = vadd.xlane.f32.xlu1 %v480_v7  ;;  %540 = vadd.xlane.f32.xlu2 %v487_v8 }
 0x100   :  { %v414_v9 = vpop.xlane.xlu0 %413 }
 0x101   :  { %v398_v10 = vpop.xlane.xlu1 %397  ;;  %v499_v11 = vpop.xlane.xlu2 %498  ;;  %454 = vst.msk [vmem:[%s1349_s5 + $0xc0] sm:$0xff] %vm429_vm1, %v414_v9 }
 0x102   :  { %446 = vst.msk [vmem:[%s1349_s5 + $0x80] sm:$0xff] %vm429_vm1, %v398_v10 }
 0x103   :  { %562 = vst.msk [vmem:[%s1350_s6] sm:$0xff] %vm429_vm1, %v499_v11 }
 0x105   :  { %377 = vadd.xlane.f32.xlu0 %v339_v12 }
 0x106   :  { %409 = vadd.xlane.f32.xlu1 %v355_v13  ;;  %393 = vadd.xlane.f32.xlu2 %v347_v14 }
 0x108   :  { %v531_v15 = vpop.xlane.xlu0 %530 }
 0x109   :  { %v416_v16 = vpop.xlane.xlu1 %415  ;;  %v547_v17 = vpop.xlane.xlu2 %546  ;;  %578 = vst.msk [vmem:[%s1350_s6 + $0x80] sm:$0xff] %vm429_vm1, %v531_v15 }
 0x10a   :  { %455 = vst.msk [vmem:[%s1349_s5 + $0xc8] sm:$0xff] %vm429_vm1, %v416_v16 }
 0x10b   :  { %586 = vst.msk [vmem:[%s1350_s6 + $0xc0] sm:$0xff] %vm429_vm1, %v547_v17 }
 0x10d   :  { %425 = vadd.xlane.f32.xlu0 %v363_v18 }
 0x10e   :  { %510 = vadd.xlane.f32.xlu2 %v472_v20  ;;  %379 = vadd.xlane.f32.xlu1 %v340_v19 }
 0x110   :  { %v368_v21 = vpop.xlane.xlu0 %367 }
 0x111   :  { %v533_v22 = vpop.xlane.xlu1 %532  ;;  %v517_v23 = vpop.xlane.xlu2 %516  ;;  %431 = vst.msk [vmem:[%s1349_s5 + $0x8] sm:$0xff] %vm429_vm1, %v368_v21 }
 0x112   :  { %579 = vst.msk [vmem:[%s1350_s6 + $0x88] sm:$0xff] %vm429_vm1, %v533_v22 }
 0x113   :  { %571 = vst.msk [vmem:[%s1350_s6 + $0x48] sm:$0xff] %vm429_vm1, %v517_v23 }
 0x115   :  { %542 = vadd.xlane.f32.xlu0 %v488_v26 }
 0x116   :  { %528 = vadd.xlane.f32.xlu2 %v481_v24  ;;  %427 = vadd.xlane.f32.xlu1 %v364_v25 }
 0x118   :  { %v384_v27 = vpop.xlane.xlu0 %383 }
 0x119   :  { %v400_v29 = vpop.xlane.xlu2 %399  ;;  %439 = vst.msk [vmem:[%s1349_s5 + $0x48] sm:$0xff] %vm429_vm1, %v384_v27  ;;  %v370_v30 = vpop.xlane.xlu1 %369 }
 0x11a   :  { %447 = vst.msk [vmem:[%s1349_s5 + $0x88] sm:$0xff] %vm429_vm1, %v400_v29 }
 0x11b   :  { %432 = vst.msk [vmem:[%s1349_s5 + $0x10] sm:$0xff] %vm429_vm1, %v370_v30 }
 0x11d   :  { %395 = vadd.xlane.f32.xlu0 %v348_v31 }
 0x11e   :  { %411 = vadd.xlane.f32.xlu2 %v356_v32  ;;  %544 = vadd.xlane.f32.xlu1 %v489_v33 }
 0x120   :  { %v501_v36 = vpop.xlane.xlu0 %500 }
 0x121   :  { %v418_v37 = vpop.xlane.xlu2 %417  ;;  %563 = vst.msk [vmem:[%s1350_s6 + $0x8] sm:$0xff] %vm429_vm1, %v501_v36  ;;  %v386_v38 = vpop.xlane.xlu1 %385 }
 0x122   :  { %456 = vst.msk [vmem:[%s1349_s5 + $0xd0] sm:$0xff] %vm429_vm1, %v418_v37 }
 0x123   :  { %440 = vst.msk [vmem:[%s1349_s5 + $0x50] sm:$0xff] %vm429_vm1, %v386_v38 }
 0x125   :  { %512 = vadd.xlane.f32.xlu0 %v473_v34 }
 0x126   :  { %558 = vadd.xlane.f32.xlu2 %v496_v39  ;;  %556 = vadd.xlane.f32.xlu1 %v495_v40 }
 0x128   :  { %v549_v41 = vpop.xlane.xlu0 %548 }
 0x129   :  { %v535_v42 = vpop.xlane.xlu2 %534  ;;  %587 = vst.msk [vmem:[%s1350_s6 + $0xc8] sm:$0xff] %vm429_vm1, %v549_v41  ;;  %v503_v43 = vpop.xlane.xlu1 %502 }
 0x12a   :  { %580 = vst.msk [vmem:[%s1350_s6 + $0x90] sm:$0xff] %vm429_vm1, %v535_v42 }
 0x12b   :  { %564 = vst.msk [vmem:[%s1350_s6 + $0x10] sm:$0xff] %vm429_vm1, %v503_v43 }
 0x12d   :  { %560 = vadd.xlane.f32.xlu0 %v497_v28 }
 0x130   :  { %v519_v44 = vpop.xlane.xlu0 %518 }
 0x131   :  { %v388_v45 = vpop.xlane.xlu2 %387  ;;  %572 = vst.msk [vmem:[%s1350_s6 + $0x50] sm:$0xff] %vm429_vm1, %v519_v44  ;;  %v551_v46 = vpop.xlane.xlu1 %550 }
 0x132   :  { %441 = vst.msk [vmem:[%s1349_s5 + $0x58] sm:$0xff] %vm429_vm1, %v388_v45 }
 0x133   :  { %588 = vst.msk [vmem:[%s1350_s6 + $0xd0] sm:$0xff] %vm429_vm1, %v551_v46 }
 0x138   :  { %v402_v35 = vpop.xlane.xlu0 %401 }
 0x139   :  { %448 = vst.msk [vmem:[%s1349_s5 + $0x90] sm:$0xff] %vm429_vm1, %v402_v35  ;;  %v505_v47 = vpop.xlane.xlu2 %504  ;;  %v372_v48 = vpop.xlane.xlu1 %371 }
 0x13a   :  { %565 = vst.msk [vmem:[%s1350_s6 + $0x18] sm:$0xff] %vm429_vm1, %v505_v47 }
 0x13b   :  { %433 = vst.msk [vmem:[%s1349_s5 + $0x18] sm:$0xff] %vm429_vm1, %v372_v48 }
 0x140   :  { %v420_v49 = vpop.xlane.xlu0 %419 }
 0x141   :  { %457 = vst.msk [vmem:[%s1349_s5 + $0xd8] sm:$0xff] %vm429_vm1, %v420_v49  ;;  %v553_v50 = vpop.xlane.xlu2 %552  ;;  %v521_v51 = vpop.xlane.xlu1 %520 }
 0x142   :  { %589 = vst.msk [vmem:[%s1350_s6 + $0xd8] sm:$0xff] %vm429_vm1, %v553_v50 }
 0x143   :  { %573 = vst.msk [vmem:[%s1350_s6 + $0x58] sm:$0xff] %vm429_vm1, %v521_v51 }
 0x148   :  { %v537_v52 = vpop.xlane.xlu0 %536 }
 0x149   :  { %581 = vst.msk [vmem:[%s1350_s6 + $0x98] sm:$0xff] %vm429_vm1, %v537_v52  ;;  %v404_v53 = vpop.xlane.xlu1 %403  ;;  %v374_v54 = vpop.xlane.xlu2 %373 }
 0x14a   :  { %449 = vst.msk [vmem:[%s1349_s5 + $0x98] sm:$0xff] %vm429_vm1, %v404_v53 }
 0x14b   :  { %434 = vst.msk [vmem:[%s1349_s5 + $0x20] sm:$0xff] %vm429_vm1, %v374_v54 }
 0x150   :  { %v390_v55 = vpop.xlane.xlu0 %389 }
 0x151   :  { %442 = vst.msk [vmem:[%s1349_s5 + $0x60] sm:$0xff] %vm429_vm1, %v390_v55  ;;  %v422_v56 = vpop.xlane.xlu1 %421  ;;  %v523_v57 = vpop.xlane.xlu2 %522 }
 0x152   :  { %458 = vst.msk [vmem:[%s1349_s5 + $0xe0] sm:$0xff] %vm429_vm1, %v422_v56 }
 0x153   :  { %574 = vst.msk [vmem:[%s1350_s6 + $0x60] sm:$0xff] %vm429_vm1, %v523_v57 }
 0x158   :  { %v507_v58 = vpop.xlane.xlu0 %506 }
 0x159   :  { %v539_v59 = vpop.xlane.xlu1 %538  ;;  %566 = vst.msk [vmem:[%s1350_s6 + $0x20] sm:$0xff] %vm429_vm1, %v507_v58  ;;  %v406_v60 = vpop.xlane.xlu2 %405 }
 0x15a   :  { %582 = vst.msk [vmem:[%s1350_s6 + $0xa0] sm:$0xff] %vm429_vm1, %v539_v59 }
 0x15b   :  { %450 = vst.msk [vmem:[%s1349_s5 + $0xa0] sm:$0xff] %vm429_vm1, %v406_v60 }
 0x160   :  { %v555_v61 = vpop.xlane.xlu0 %554 }
 0x161   :  { %v392_v62 = vpop.xlane.xlu1 %391  ;;  %590 = vst.msk [vmem:[%s1350_s6 + $0xe0] sm:$0xff] %vm429_vm1, %v555_v61  ;;  %v376_v63 = vpop.xlane.xlu2 %375 }
 0x162   :  { %443 = vst.msk [vmem:[%s1349_s5 + $0x68] sm:$0xff] %vm429_vm1, %v392_v62 }
 0x163   :  { %435 = vst.msk [vmem:[%s1349_s5 + $0x28] sm:$0xff] %vm429_vm1, %v376_v63 }
 0x168   :  { %v525_v0 = vpop.xlane.xlu0 %524 }
 0x169   :  { %575 = vst.msk [vmem:[%s1350_s6 + $0x68] sm:$0xff] %vm429_vm1, %v525_v0  ;;  %v509_v1 = vpop.xlane.xlu1 %508  ;;  %v424_v2 = vpop.xlane.xlu2 %423 }
 0x16a   :  { %567 = vst.msk [vmem:[%s1350_s6 + $0x28] sm:$0xff] %vm429_vm1, %v509_v1 }
 0x16b   :  { %459 = vst.msk [vmem:[%s1349_s5 + $0xe8] sm:$0xff] %vm429_vm1, %v424_v2 }
 0x170   :  { %v408_v3 = vpop.xlane.xlu0 %407 }
 0x171   :  { %451 = vst.msk [vmem:[%s1349_s5 + $0xa8] sm:$0xff] %vm429_vm1, %v408_v3  ;;  %v527_v4 = vpop.xlane.xlu1 %526  ;;  %v541_v5 = vpop.xlane.xlu2 %540 }
 0x172   :  { %576 = vst.msk [vmem:[%s1350_s6 + $0x70] sm:$0xff] %vm429_vm1, %v527_v4 }
 0x173   :  { %583 = vst.msk [vmem:[%s1350_s6 + $0xa8] sm:$0xff] %vm429_vm1, %v541_v5 }
 0x178   :  { %v378_v6 = vpop.xlane.xlu0 %377 }
 0x179   :  { %v410_v7 = vpop.xlane.xlu1 %409  ;;  %v394_v8 = vpop.xlane.xlu2 %393  ;;  %436 = vst.msk [vmem:[%s1349_s5 + $0x30] sm:$0xff] %vm429_vm1, %v378_v6 }
 0x17a   :  { %452 = vst.msk [vmem:[%s1349_s5 + $0xb0] sm:$0xff] %vm429_vm1, %v410_v7 }
 0x17b   :  { %444 = vst.msk [vmem:[%s1349_s5 + $0x70] sm:$0xff] %vm429_vm1, %v394_v8 }
 0x180   :  { %v426_v9 = vpop.xlane.xlu0 %425 }
 0x181   :  { %v511_v10 = vpop.xlane.xlu2 %510  ;;  %460 = vst.msk [vmem:[%s1349_s5 + $0xf0] sm:$0xff] %vm429_vm1, %v426_v9  ;;  %v380_v11 = vpop.xlane.xlu1 %379 }
 0x182   :  { %568 = vst.msk [vmem:[%s1350_s6 + $0x30] sm:$0xff] %vm429_vm1, %v511_v10 }
 0x183   :  { %437 = vst.msk [vmem:[%s1349_s5 + $0x38] sm:$0xff] %vm429_vm1, %v380_v11 }
 0x188   :  { %v543_v12 = vpop.xlane.xlu0 %542 }
 0x189   :  { %v529_v13 = vpop.xlane.xlu2 %528  ;;  %584 = vst.msk [vmem:[%s1350_s6 + $0xb0] sm:$0xff] %vm429_vm1, %v543_v12  ;;  %v428_v14 = vpop.xlane.xlu1 %427 }
 0x18a   :  { %577 = vst.msk [vmem:[%s1350_s6 + $0x78] sm:$0xff] %vm429_vm1, %v529_v13 }
 0x18b   :  { %461 = vst.msk [vmem:[%s1349_s5 + $0xf8] sm:$0xff] %vm429_vm1, %v428_v14 }
 0x190   :  { %v396_v15 = vpop.xlane.xlu0 %395 }
 0x191   :  { %v412_v16 = vpop.xlane.xlu2 %411  ;;  %445 = vst.msk [vmem:[%s1349_s5 + $0x78] sm:$0xff] %vm429_vm1, %v396_v15  ;;  %v545_v17 = vpop.xlane.xlu1 %544 }
 0x192   :  { %453 = vst.msk [vmem:[%s1349_s5 + $0xb8] sm:$0xff] %vm429_vm1, %v412_v16 }
 0x193   :  { %585 = vst.msk [vmem:[%s1350_s6 + $0xb8] sm:$0xff] %vm429_vm1, %v545_v17 }
 0x198   :  { %v513_v18 = vpop.xlane.xlu0 %512 }
 0x199   :  { %v559_v19 = vpop.xlane.xlu2 %558  ;;  %569 = vst.msk [vmem:[%s1350_s6 + $0x38] sm:$0xff] %vm429_vm1, %v513_v18  ;;  %v557_v20 = vpop.xlane.xlu1 %556 }
 0x19a   :  { %592 = vst.msk [vmem:[%s1350_s6 + $0xf0] sm:$0xff] %vm429_vm1, %v559_v19 }
 0x19b   :  { %591 = vst.msk [vmem:[%s1350_s6 + $0xe8] sm:$0xff] %vm429_vm1, %v557_v20 }
 0x1a0   :  { %v561_v21 = vpop.xlane.xlu0 %560 }
 0x1a1   :  { %593 = vst.msk [vmem:[%s1350_s6 + $0xf8] sm:$0xff] %vm429_vm1, %v561_v21 }
 0x1a2   :  { %782 = dma.done.wait [#allocation3], 2048  }
 0x1a3   :  { %783 = vsyncadd [#allocation3], 4294965248 }
 0x1a4   :  { %619 = vsyncpa [#allocation3], 1 }

</bundles_post_ra>
